<compile_context>
chip_gen: v5e
topology: v5e:2x2
jax: 0.10.0
libtpu: 0.0.40
codegen_flags: <defaults>
</compile_context>

<pallas_src>
import jax
import jax.numpy as jnp
from jax.experimental import pallas as pl
from jax.experimental.pallas import tpu as pltpu


def edge_model_kernel(s_ref, t_ref, e_ref,
                      w1_ref, b1_ref, w2_ref, b2_ref,
                      o_ref, cat_ref):
    nd = s_ref.shape[1]
    ed = e_ref.shape[1]

    # Build cat([source, target, edge_attr], 1) for this tile in VMEM scratch:
    # three cheap masked lane-range stores, then one dense K=(2*nd+ed) dot.
    cat_ref[:, 0:nd] = s_ref[...]
    cat_ref[:, nd:2 * nd] = t_ref[...]
    cat_ref[:, 2 * nd:2 * nd + ed] = e_ref[...]

    # Layer 1: bf16 matmul on MXU, f32 accumulate; bias + ReLU in f32.
    h = jnp.dot(cat_ref[...], w1_ref[...], preferred_element_type=jnp.float32)
    h = jnp.maximum(h + b1_ref[...], 0.0)

    # Layer 2: cast activations back to bf16 for the MXU, f32 accumulate.
    out = jnp.dot(h.astype(w2_ref.dtype), w2_ref[...],
                  preferred_element_type=jnp.float32)
    out = jnp.maximum(out + b2_ref[...], 0.0)
    o_ref[...] = out.astype(o_ref.dtype)


def edge_model(source, target, edge_attr, w1, b1, w2, b2, *, tile_e=1024):
    """source/target: [E, node_dim]; edge_attr: [E, edge_dim].

    w1: [2*node_dim + edge_dim, hidden] (bf16), b1: [1, hidden] (f32),
    w2: [hidden, out_dim] (bf16),               b2: [1, out_dim] (f32).
    """
    assert tile_e % 8 == 0
    E, node_dim = source.shape
    edge_dim = edge_attr.shape[1]
    in_dim = 2 * node_dim + edge_dim
    hidden = w1.shape[1]
    out_dim = w2.shape[1]
    assert w1.shape[0] == in_dim and w2.shape[0] == hidden

    def _bf16(x):
        return x if x.dtype == jnp.bfloat16 else x.astype(jnp.bfloat16)

    source, target, edge_attr = _bf16(source), _bf16(target), _bf16(edge_attr)
    w1, w2 = _bf16(w1), _bf16(w2)
    b1, b2 = b1.astype(jnp.float32), b2.astype(jnp.float32)

    # Effective tile: as big as requested, but keep >=2 grid steps so the edge
    # axis can shard across v7x's two TensorCores (and stay a multiple of 8).
    te = min(tile_e, max(8, pl.next_power_of_2((E + 1) // 2)))

    # Pad edge count to a tile multiple; padded rows are zeros and sliced off.
    e_pad = pl.cdiv(E, te) * te
    if e_pad != E:
        pad = e_pad - E
        source = jnp.pad(source, ((0, pad), (0, 0)))
        target = jnp.pad(target, ((0, pad), (0, 0)))
        edge_attr = jnp.pad(edge_attr, ((0, pad), (0, 0)))

    grid = (e_pad // te,)
    edge_spec = lambda d: pl.BlockSpec((te, d), lambda i: (i, 0))
    const_spec = lambda shp: pl.BlockSpec(shp, lambda i: (0, 0))

    out = pl.pallas_call(
        edge_model_kernel,
        out_shape=jax.ShapeDtypeStruct((e_pad, out_dim), jnp.bfloat16),
        grid_spec=pltpu.PrefetchScalarGridSpec(
            num_scalar_prefetch=0,
            grid=grid,
            in_specs=[
                edge_spec(node_dim),        # source tile
                edge_spec(node_dim),        # target tile
                edge_spec(edge_dim),        # edge_attr tile
                const_spec(w1.shape),       # W1 (pre-concatenated), fetched once
                const_spec(b1.shape),       # b1
                const_spec(w2.shape),       # W2
                const_spec(b2.shape),       # b2
            ],
            out_specs=pl.BlockSpec((te, out_dim), lambda i: (i, 0)),
            scratch_shapes=[pltpu.VMEM((te, in_dim), jnp.bfloat16)],
        ),
        compiler_params=pltpu.CompilerParams(
            dimension_semantics=("parallel",)),
    )(source, target, edge_attr, w1, b1, w2, b2)

    return out[:E] if e_pad != E else out


def make_params(key, node_dim, edge_dim, hidden, out_dim):
    """Deterministic synthetic edge-MLP weights (x @ W + b convention)."""
    in_dim = 2 * node_dim + edge_dim
    k1, k2, k3, k4 = jax.random.split(key, 4)
    w1 = (jax.random.normal(k1, (in_dim, hidden), jnp.float32) * 0.05
          ).astype(jnp.bfloat16)
    b1 = jax.random.normal(k2, (1, hidden), jnp.float32) * 0.05
    w2 = (jax.random.normal(k3, (hidden, out_dim), jnp.float32) * 0.05
          ).astype(jnp.bfloat16)
    b2 = jax.random.normal(k4, (1, out_dim), jnp.float32) * 0.05
    return w1, b1, w2, b2


def edge_model_ref(source, target, edge_attr, params):
    """Pure-JAX reference mirroring the kernel's bf16-in / f32-math recipe."""
    w1, b1, w2, b2 = params
    x = jnp.concatenate([source, target, edge_attr], axis=1).astype(jnp.float32)
    h = jnp.maximum(x @ w1.astype(jnp.float32) + b1, 0.0)
    h = h.astype(jnp.bfloat16).astype(jnp.float32)
    out = jnp.maximum(h @ w2.astype(jnp.float32) + b2, 0.0)
    return out


if __name__ == "__main__":
    E, node_dim, edge_dim, hidden, out_dim = 256, 32, 16, 64, 16

    key = jax.random.PRNGKey(0)
    ks, kt, ke, kp = jax.random.split(key, 4)
    source = jax.random.normal(ks, (E, node_dim), jnp.float32).astype(jnp.bfloat16)
    target = jax.random.normal(kt, (E, node_dim), jnp.float32).astype(jnp.bfloat16)
    edge_attr = jax.random.normal(ke, (E, edge_dim), jnp.float32).astype(jnp.bfloat16)

    params = make_params(kp, node_dim, edge_dim, hidden, out_dim)

    out = edge_model(source, target, edge_attr, *params)
    out = jax.block_until_ready(out)

    ref = edge_model_ref(source, target, edge_attr, params)
    assert out.shape == (E, out_dim)
    assert out.dtype == jnp.bfloat16
    assert jnp.allclose(out.astype(jnp.float32), ref, atol=2e-2, rtol=2e-2), \
        "mismatch vs reference"

    print("KERNEL_OK")
</pallas_src>

<mosaic_0001>
module attributes {stable_mosaic.version = 11 : i64} {
  func.func @edge_model_kernel(%arg0: i32, %arg1: memref<128x32xbf16, #tpu.memory_space<vmem>>, %arg2: memref<128x32xbf16, #tpu.memory_space<vmem>>, %arg3: memref<128x16xbf16, #tpu.memory_space<vmem>>, %arg4: memref<80x64xbf16, #tpu.memory_space<vmem>>, %arg5: memref<1x64xf32, #tpu.memory_space<vmem>>, %arg6: memref<64x16xbf16, #tpu.memory_space<vmem>>, %arg7: memref<1x16xf32, #tpu.memory_space<vmem>>, %arg8: memref<128x16xbf16, #tpu.memory_space<vmem>>, %arg9: memref<128x80xbf16, #tpu.memory_space<vmem>>) attributes {dimension_semantics = [#tpu.dimension_semantics<parallel>], iteration_bounds = array<i64: 2>, scalar_prefetch = 0 : i64, scratch_operands = 1 : i64, tpu.core_type = #tpu.core_type<tc>, window_params = [{transform_indices = @transform_0, window_bounds = array<i64: 128, 32>}, {transform_indices = @transform_1, window_bounds = array<i64: 128, 32>}, {transform_indices = @transform_2, window_bounds = array<i64: 128, 16>}, {pipeline_mode = #tpu.pipeline_mode<synchronous>, transform_indices = @transform_3, window_bounds = array<i64: 80, 64>}, {pipeline_mode = #tpu.pipeline_mode<synchronous>, transform_indices = @transform_4, window_bounds = array<i64: 1, 64>}, {pipeline_mode = #tpu.pipeline_mode<synchronous>, transform_indices = @transform_5, window_bounds = array<i64: 64, 16>}, {pipeline_mode = #tpu.pipeline_mode<synchronous>, transform_indices = @transform_6, window_bounds = array<i64: 1, 16>}, {transform_indices = @transform_7, window_bounds = array<i64: 128, 16>}]} {
    %c0 = arith.constant 0 : index
    %c0_0 = arith.constant 0 : index
    %0 = vector.load %arg1[%c0, %c0_0] : memref<128x32xbf16, #tpu.memory_space<vmem>>, vector<128x32xbf16>
    %c0_1 = arith.constant 0 : index
    %c0_2 = arith.constant 0 : index
    %1 = vector.load %arg9[%c0_1, %c0_2] : memref<128x80xbf16, #tpu.memory_space<vmem>>, vector<128x32xbf16>
    tpu.vector_store %arg9[%c0_1, %c0_2], %0 {strides = array<i32>} : memref<128x80xbf16, #tpu.memory_space<vmem>>, vector<128x32xbf16>,
    %c0_3 = arith.constant 0 : index
    %c0_4 = arith.constant 0 : index
    %2 = vector.load %arg2[%c0_3, %c0_4] : memref<128x32xbf16, #tpu.memory_space<vmem>>, vector<128x32xbf16>
    %c0_5 = arith.constant 0 : index
    %c32 = arith.constant 32 : index
    %3 = vector.load %arg9[%c0_5, %c32] : memref<128x80xbf16, #tpu.memory_space<vmem>>, vector<128x32xbf16>
    tpu.vector_store %arg9[%c0_5, %c32], %2 {strides = array<i32>} : memref<128x80xbf16, #tpu.memory_space<vmem>>, vector<128x32xbf16>,
    %c0_6 = arith.constant 0 : index
    %c0_7 = arith.constant 0 : index
    %4 = vector.load %arg3[%c0_6, %c0_7] : memref<128x16xbf16, #tpu.memory_space<vmem>>, vector<128x16xbf16>
    %c0_8 = arith.constant 0 : index
    %c64 = arith.constant 64 : index
    %5 = vector.load %arg9[%c0_8, %c64] : memref<128x80xbf16, #tpu.memory_space<vmem>>, vector<128x16xbf16>
    tpu.vector_store %arg9[%c0_8, %c64], %4 {strides = array<i32>} : memref<128x80xbf16, #tpu.memory_space<vmem>>, vector<128x16xbf16>,
    %c0_9 = arith.constant 0 : index
    %c0_10 = arith.constant 0 : index
    %6 = vector.load %arg9[%c0_9, %c0_10] : memref<128x80xbf16, #tpu.memory_space<vmem>>, vector<128x80xbf16>
    %c0_11 = arith.constant 0 : index
    %c0_12 = arith.constant 0 : index
    %7 = vector.load %arg4[%c0_11, %c0_12] : memref<80x64xbf16, #tpu.memory_space<vmem>>, vector<80x64xbf16>
    %cst = arith.constant dense<0.000000e+00> : vector<128x64xf32>
    %8 = tpu.matmul %6, %7, %cst {dimension_numbers = #tpu.dot_dimension_numbers<[1], [0], [0], [1], [0, 0, 1, 1], [], []>} : vector<128x80xbf16>, vector<80x64xbf16>, vector<128x64xf32> -> vector<128x64xf32>
    %c0_13 = arith.constant 0 : index
    %c0_14 = arith.constant 0 : index
    %9 = vector.load %arg5[%c0_13, %c0_14] : memref<1x64xf32, #tpu.memory_space<vmem>>, vector<1x64xf32>
    %10 = vector.broadcast %9 : vector<1x64xf32> to vector<128x64xf32>
    %11 = arith.addf %8, %10 : vector<128x64xf32>
    %cst_15 = arith.constant 0.000000e+00 : f32
    %12 = vector.broadcast %cst_15 : f32 to vector<128x64xf32>
    %13 = arith.maximumf %11, %12 : vector<128x64xf32>
    %14 = arith.truncf %13 : vector<128x64xf32> to vector<128x64xbf16>
    %c0_16 = arith.constant 0 : index
    %c0_17 = arith.constant 0 : index
    %15 = vector.load %arg6[%c0_16, %c0_17] : memref<64x16xbf16, #tpu.memory_space<vmem>>, vector<64x16xbf16>
    %cst_18 = arith.constant dense<0.000000e+00> : vector<128x16xf32>
    %16 = tpu.matmul %14, %15, %cst_18 {dimension_numbers = #tpu.dot_dimension_numbers<[1], [0], [0], [1], [0, 0, 1, 1], [], []>} : vector<128x64xbf16>, vector<64x16xbf16>, vector<128x16xf32> -> vector<128x16xf32>
    %c0_19 = arith.constant 0 : index
    %c0_20 = arith.constant 0 : index
    %17 = vector.load %arg7[%c0_19, %c0_20] : memref<1x16xf32, #tpu.memory_space<vmem>>, vector<1x16xf32>
    %18 = vector.broadcast %17 : vector<1x16xf32> to vector<128x16xf32>
    %19 = arith.addf %16, %18 : vector<128x16xf32>
    %cst_21 = arith.constant 0.000000e+00 : f32
    %20 = vector.broadcast %cst_21 : f32 to vector<128x16xf32>
    %21 = arith.maximumf %19, %20 : vector<128x16xf32>
    %22 = arith.truncf %21 : vector<128x16xf32> to vector<128x16xbf16>
    %c0_22 = arith.constant 0 : index
    %c0_23 = arith.constant 0 : index
    %23 = vector.load %arg8[%c0_22, %c0_23] : memref<128x16xbf16, #tpu.memory_space<vmem>>, vector<128x16xbf16>
    tpu.vector_store %arg8[%c0_22, %c0_23], %22 {strides = array<i32>} : memref<128x16xbf16, #tpu.memory_space<vmem>>, vector<128x16xbf16>,
    return
  }
  func.func @transform_0(%arg0: i32) -> (i32, i32) {
    %c0_i32 = arith.constant 0 : i32
    %c0_i32_0 = arith.constant 0 : i32
    return %arg0, %c0_i32 : i32, i32
  }
  func.func @transform_1(%arg0: i32) -> (i32, i32) {
    %c0_i32 = arith.constant 0 : i32
    %c0_i32_0 = arith.constant 0 : i32
    return %arg0, %c0_i32 : i32, i32
  }
  func.func @transform_2(%arg0: i32) -> (i32, i32) {
    %c0_i32 = arith.constant 0 : i32
    %c0_i32_0 = arith.constant 0 : i32
    return %arg0, %c0_i32 : i32, i32
  }
  func.func @transform_3(%arg0: i32) -> (i32, i32) {
    %c0_i32 = arith.constant 0 : i32
    %c0_i32_0 = arith.constant 0 : i32
    %c0_i32_1 = arith.constant 0 : i32
    return %c0_i32, %c0_i32_0 : i32, i32
  }
  func.func @transform_4(%arg0: i32) -> (i32, i32) {
    %c0_i32 = arith.constant 0 : i32
    %c0_i32_0 = arith.constant 0 : i32
    %c0_i32_1 = arith.constant 0 : i32
    return %c0_i32, %c0_i32_0 : i32, i32
  }
  func.func @transform_5(%arg0: i32) -> (i32, i32) {
    %c0_i32 = arith.constant 0 : i32
    %c0_i32_0 = arith.constant 0 : i32
    %c0_i32_1 = arith.constant 0 : i32
    return %c0_i32, %c0_i32_0 : i32, i32
  }
  func.func @transform_6(%arg0: i32) -> (i32, i32) {
    %c0_i32 = arith.constant 0 : i32
    %c0_i32_0 = arith.constant 0 : i32
    %c0_i32_1 = arith.constant 0 : i32
    return %c0_i32, %c0_i32_0 : i32, i32
  }
  func.func @transform_7(%arg0: i32) -> (i32, i32) {
    %c0_i32 = arith.constant 0 : i32
    %c0_i32_0 = arith.constant 0 : i32
    return %arg0, %c0_i32 : i32, i32
  }
}

</mosaic_0001>

<bundles_post_ra>
// kernel: tpu_custom_call.1
= control target key start
LH: loop header
LB: loop body
LE: loop exit
PB: predicated region body
PF: predicated region fallthrough
CT: control target
= control target key end

     0   :  { %s1178_s24 = smov 0   ;;  %s1442_s0 = inlined_call_operand.vmem [shape: bf16[256,32], index: 0, kind: input, shape index: {}]   ;;  %s1443_s1 = inlined_call_operand.vmem [shape: bf16[256,32], index: 1, kind: input, shape index: {}]   ;;  %s1444_s2 = inlined_call_operand.vmem [shape: bf16[256,16], index: 2, kind: input, shape index: {}]   ;;  %s1445_s3 = inlined_call_operand.vmem [shape: bf16[80,64], index: 3, kind: input, shape index: {}]   ;;  %s1446_s4 = inlined_call_operand.vmem [shape: f32[1,64], index: 4, kind: input, shape index: {}]   ;;  %s1447_s5 = inlined_call_operand.vmem [shape: bf16[64,16], index: 5, kind: input, shape index: {}]   ;;  %s1448_s6 = inlined_call_operand.vmem [shape: f32[1,16], index: 6, kind: input, shape index: {}]   ;;  %s1449_s7 = inlined_call_operand.vmem [shape: bf16[256,16], index: 7, kind: output, shape index: {}]  }
   0x1 LB: > { %s991_s25 = sadd.s32 4294967295, %s1134_s24   ;;  %p995_p0 = scmp.ge.s32.totalorder %s1134_s24, 1  ;;  %s1134_s24 = sphi %s1178_s24, %s17_s24  }
   0x2   : > { %p260_p1 = scmp.lt.s32.totalorder %s1134_s24, 3 }
   0x4   : > { %p261_p2 = pnand %p995_p0, %p260_p1 }
   0x5   : > { %s996_s26 = sshll.u32 (!%p261_p2), %s991_s25, 4  ;;  %s1136_s11 = smov (!%p261_p2), 64  }
   0x6   : > { %264 = sbr.rel (%p261_p2) target bundleno = 512 (0x200), region = 48  ;;  %p303_p3 = scmp.lt.s32.totalorder (!%p261_p2), %s996_s26, 31 }
   0x7   : > { %s1137_s12 = smov (!%p261_p2), 32  }
   0xb   : > { %s1451_s26 = smov (!%p303_p3, %s996_s26), 31  ;;  %v1102_v32 = vld [vmem:[%s1445_s3 + $0x20] sm:$0xff]  ;;  %vm343_vm0 = vcmask 257024   ;;  %v1101_v35 = vld [vmem:[%s1445_s3 + $0x18] sm:$0xff]  ;;  %v1100_v36 = vld [vmem:[%s1445_s3 + $0x10] sm:$0xff]  ;;  %vm440_vm1 = vcmask 519424  }
   0xc   : > { %s1186_s27 = sshll.u32 %s1451_s26, 2  ;;  %682 = vmatpush.bf16.msra.mxu0 %v1102_v32  ;;  %1107 = vmatpush.bf16.msra.mxu2 %v1102_v32  ;;  %v1099_v39 = vld [vmem:[%s1445_s3 + $0x8] sm:$0xff]  ;;  %v1098_v41 = vld [vmem:[%s1445_s3] sm:$0xff]  ;;  %vm537_vm2 = vcmask 650752   ;;  %vm654_vm3 = vcmask 654336   ;;  %vm788_vm4 = vcmask 523264  }
   0xd   : > { %s1192_s30 = scalar_lea.vmem %s1444_s2, %s1186_s27  ;;  %s1198_s10 = scalar_lea.vmem %s1443_s1, %s1186_s27  ;;  %v1103_v32 = vld [vmem:[%s1447_s5] sm:$0xff]  ;;  %vm894_vm5 = vcmask 125952  }
   0xe   : > { %v457_v0 = vld [vmem:[%s1192_s30] sm:$0xf]  ;;  %v458_v3 = vld [vmem:[%s1192_s30 + $0x4] sm:$0xf]  ;;  %v362_v8 = vld [vmem:[%s1198_s10 + $0x8] sm:$0xf]  ;;  %s1266_s15 = scalar_lea.vmem %s1442_s0, %s1186_s27  ;;  %s1390_s19 = scalar_lea.vmem %s1449_s7, %s1186_s27 }
   0xf   : > { %v360_v1 = vld [vmem:[%s1198_s10] sm:$0xf]  ;;  %489 = vrot.lane.b32.xlu1 %v457_v0, %s1136_s11  ;;  %v361_v4 = vld [vmem:[%s1198_s10 + $0x4] sm:$0xf]  ;;  %v459_v9 = vld [vmem:[%s1192_s30 + $0x8] sm:$0xf] }
  0x10   : > { %392 = vrot.lane.b32.xlu0 %v360_v1, %s1137_s12  ;;  %v368_v2 = vld [vmem:[%s1198_s10 + $0x20] sm:$0xf]  ;;  %v369_v5 = vld [vmem:[%s1198_s10 + $0x24] sm:$0xf]  ;;  %v363_v10 = vld [vmem:[%s1198_s10 + $0xc] sm:$0xf]  ;;  %683 = vmatpush.bf16.msra.mxu0 %v1101_v35 }
  0x11   : > { %408 = vrot.lane.b32.xlu2 %v368_v2, %s1137_s12  ;;  %v466_v6 = vld [vmem:[%s1192_s30 + $0x24] sm:$0xf]  ;;  %v465_v7 = vld [vmem:[%s1192_s30 + $0x20] sm:$0xf]  ;;  %v460_v11 = vld [vmem:[%s1192_s30 + $0xc] sm:$0xf]  ;;  %1108 = vmatpush.bf16.msra.mxu2 %v1101_v35 }
  0x12   : > { %v371_v12 = vld [vmem:[%s1198_s10 + $0x2c] sm:$0xf]  ;;  %v370_v13 = vld [vmem:[%s1198_s10 + $0x28] sm:$0xf]  ;;  %v364_v15 = vld [vmem:[%s1198_s10 + $0x10] sm:$0xf] }
  0x13   : > { %v467_v14 = vld [vmem:[%s1192_s30 + $0x28] sm:$0xf]  ;;  %v468_v16 = vld [vmem:[%s1192_s30 + $0x2c] sm:$0xf]  ;;  %v365_v17 = vld [vmem:[%s1198_s10 + $0x14] sm:$0xf] }
  0x14   : > { %v462_v18 = vld [vmem:[%s1192_s30 + $0x14] sm:$0xf]  ;;  %v461_v19 = vld [vmem:[%s1192_s30 + $0x10] sm:$0xf]  ;;  %v367_v24 = vld [vmem:[%s1198_s10 + $0x1c] sm:$0xf]  ;;  %684 = vmatpush.bf16.msra.mxu0 %v1100_v36 }
  0x15   : > { %v372_v20 = vld [vmem:[%s1198_s10 + $0x30] sm:$0xf]  ;;  %v373_v22 = vld [vmem:[%s1198_s10 + $0x34] sm:$0xf]  ;;  %v366_v25 = vld [vmem:[%s1198_s10 + $0x18] sm:$0xf]  ;;  %1109 = vmatpush.bf16.msra.mxu2 %v1100_v36 }
  0x16   : > { %v469_v21 = vld [vmem:[%s1192_s30 + $0x30] sm:$0xf]  ;;  %v470_v23 = vld [vmem:[%s1192_s30 + $0x34] sm:$0xf]  ;;  %v463_v26 = vld [vmem:[%s1192_s30 + $0x18] sm:$0xf] }
  0x17   : > { %491 = vrot.lane.b32.xlu1 %v458_v3, %s1136_s11  ;;  %v374_v27 = vld [vmem:[%s1198_s10 + $0x38] sm:$0xf]  ;;  %v464_v28 = vld [vmem:[%s1192_s30 + $0x1c] sm:$0xf]  ;;  %v327_v33 = vld [vmem:[%s1266_s15] sm:$0xf] }
  0x18   : > { %394 = vrot.lane.b32.xlu0 %v361_v4, %s1137_s12  ;;  %v375_v29 = vld [vmem:[%s1198_s10 + $0x3c] sm:$0xf]  ;;  %v471_v31 = vld [vmem:[%s1192_s30 + $0x38] sm:$0xf]  ;;  %344 = vst.msk [vmem:[#allocation2] sm:$0xf] %vm343_vm0, %v327_v33  ;;  %685 = vmatpush.bf16.msra.mxu0 %v1099_v39 }
  0x19   : > { %410 = vrot.lane.b32.xlu2 %v369_v5, %s1137_s12  ;;  %v472_v30 = vld [vmem:[%s1192_s30 + $0x3c] sm:$0xf]  ;;  %v335_v34 = vld [vmem:[%s1266_s15 + $0x20] sm:$0xf]  ;;  %v328_v37 = vld [vmem:[%s1266_s15 + $0x4] sm:$0xf]  ;;  %1110 = vmatpush.bf16.msra.mxu2 %v1099_v39 }
  0x1a   : > { %352 = vst.msk [vmem:[#allocation2 + $0x20] sm:$0xf] %vm343_vm0, %v335_v34  ;;  %v336_v38 = vld [vmem:[%s1266_s15 + $0x24] sm:$0xf]  ;;  %v329_v42 = vld [vmem:[%s1266_s15 + $0x8] sm:$0xf] }
  0x1b   : > { %345 = vst.msk [vmem:[#allocation2 + $0x4] sm:$0xf] %vm343_vm0, %v328_v37  ;;  %v330_v44 = vld [vmem:[%s1266_s15 + $0xc] sm:$0xf]  ;;  %v337_v49 = vld [vmem:[%s1266_s15 + $0x28] sm:$0xf] }
  0x1c   : > { %353 = vst.msk [vmem:[#allocation2 + $0x24] sm:$0xf] %vm343_vm0, %v336_v38  ;;  %686 = vmatpush.bf16.msra.mxu0 %v1098_v41  ;;  %v338_v48 = vld [vmem:[%s1266_s15 + $0x2c] sm:$0xf]  ;;  %v331_v53 = vld [vmem:[%s1266_s15 + $0x10] sm:$0xf] }
  0x1d   : > { %1111 = vmatpush.bf16.msra.mxu2 %v1098_v41  ;;  %346 = vst.msk [vmem:[#allocation2 + $0x8] sm:$0xf] %vm343_vm0, %v329_v42  ;;  %v332_v54 = vld [vmem:[%s1266_s15 + $0x14] sm:$0xf]  ;;  %v339_v59 = vld [vmem:[%s1266_s15 + $0x30] sm:$0xf] }
  0x1e   : > { %347 = vst.msk [vmem:[#allocation2 + $0xc] sm:$0xf] %vm343_vm0, %v330_v44  ;;  %v340_v0 = vld [vmem:[%s1266_s15 + $0x34] sm:$0xf]  ;;  %v334_v4 = vld [vmem:[%s1266_s15 + $0x1c] sm:$0xf] }
  0x1f   : > { %507 = vrot.lane.b32.xlu1 %v466_v6, %s1136_s11  ;;  %355 = vst.msk [vmem:[#allocation2 + $0x2c] sm:$0xf] %vm343_vm0, %v338_v48  ;;  %v333_v6 = vld [vmem:[%s1266_s15 + $0x18] sm:$0xf]  ;;  %v1126_v34 = vld [vmem:[%s1446_s4] ss:$0 sm:$0xff] }
  0x20   : > { %505 = vrot.lane.b32.xlu0 %v465_v7, %s1136_s11  ;;  %354 = vst.msk [vmem:[#allocation2 + $0x28] sm:$0xf] %vm343_vm0, %v337_v49 }
  0x21   : > { %396 = vrot.lane.b32.xlu2 %v362_v8, %s1137_s12  ;;  %348 = vst.msk [vmem:[#allocation2 + $0x10] sm:$0xf] %vm343_vm0, %v331_v53 }
  0x22   : > { %349 = vst.msk [vmem:[#allocation2 + $0x14] sm:$0xf] %vm343_vm0, %v332_v54 }
  0x23   : > { %356 = vst.msk [vmem:[#allocation2 + $0x30] sm:$0xf] %vm343_vm0, %v339_v59 }
  0x24   : > { %357 = vst.msk [vmem:[#allocation2 + $0x34] sm:$0xf] %vm343_vm0, %v340_v0 }
  0x25   : > { %351 = vst.msk [vmem:[#allocation2 + $0x1c] sm:$0xf] %vm343_vm0, %v334_v4 }
  0x26   : > { %350 = vst.msk [vmem:[#allocation2 + $0x18] sm:$0xf] %vm343_vm0, %v333_v6 }
  0x27   : > { %493 = vrot.lane.b32.xlu1 %v459_v9, %s1136_s11 }
  0x28   : > { %398 = vrot.lane.b32.xlu0 %v363_v10, %s1137_s12  ;;  %v341_v10 = vld [vmem:[%s1266_s15 + $0x38] sm:$0xf] }
  0x29   : > { %495 = vrot.lane.b32.xlu2 %v460_v11, %s1136_s11  ;;  %v342_v11 = vld [vmem:[%s1266_s15 + $0x3c] sm:$0xf]  ;;  %358 = vst.msk [vmem:[#allocation2 + $0x38] sm:$0xf] %vm343_vm0, %v341_v10 }
  0x2a   : > { %359 = vst.msk [vmem:[#allocation2 + $0x3c] sm:$0xf] %vm343_vm0, %v342_v11 }
  0x2f   : > { %414 = vrot.lane.b32.xlu1 %v371_v12, %s1137_s12 }
  0x30   : > { %412 = vrot.lane.b32.xlu0 %v370_v13, %s1137_s12 }
  0x31   : > { %509 = vrot.lane.b32.xlu2 %v467_v14, %s1136_s11 }
  0x37   : > { %400 = vrot.lane.b32.xlu1 %v364_v15, %s1137_s12 }
  0x38   : > { %511 = vrot.lane.b32.xlu0 %v468_v16, %s1136_s11 }
  0x39   : > { %402 = vrot.lane.b32.xlu2 %v365_v17, %s1137_s12 }
  0x3f   : > { %499 = vrot.lane.b32.xlu1 %v462_v18, %s1136_s11 }
  0x40   : > { %497 = vrot.lane.b32.xlu0 %v461_v19, %s1136_s11 }
  0x41   : > { %416 = vrot.lane.b32.xlu2 %v372_v20, %s1137_s12 }
  0x47   : > { %513 = vrot.lane.b32.xlu1 %v469_v21, %s1136_s11 }
  0x48   : > { %418 = vrot.lane.b32.xlu0 %v373_v22, %s1137_s12 }
  0x49   : > { %515 = vrot.lane.b32.xlu2 %v470_v23, %s1136_s11 }
  0x4f   : > { %406 = vrot.lane.b32.xlu1 %v367_v24, %s1137_s12 }
  0x50   : > { %404 = vrot.lane.b32.xlu0 %v366_v25, %s1137_s12 }
  0x51   : > { %501 = vrot.lane.b32.xlu2 %v463_v26, %s1136_s11 }
  0x57   : > { %420 = vrot.lane.b32.xlu1 %v374_v27, %s1137_s12 }
  0x58   : > { %503 = vrot.lane.b32.xlu0 %v464_v28, %s1136_s11 }
  0x59   : > { %422 = vrot.lane.b32.xlu2 %v375_v29, %s1137_s12  ;;  %v1106_v29 = vld [vmem:[%s1447_s5 + $0x18] sm:$0xff] }
  0x5a   : > { %817 = vmatpush.bf16.msra.mxu1 %v1106_v29  ;;  %1112 = vmatpush.bf16.msra.mxu3 %v1106_v29 }
  0x5f   : > { %519 = vrot.lane.b32.xlu1 %v472_v30, %s1136_s11  ;;  %v1105_v30 = vld [vmem:[%s1447_s5 + $0x10] sm:$0xff] }
  0x60   : > { %517 = vrot.lane.b32.xlu0 %v471_v31, %s1136_s11  ;;  %818 = vmatpush.bf16.msra.mxu1 %v1105_v30  ;;  %v1104_v31 = vld [vmem:[%s1447_s5 + $0x8] sm:$0xff] }
  0x61   : > { %1113 = vmatpush.bf16.msra.mxu3 %v1105_v30 }
  0x64   : > { %819 = vmatpush.bf16.msra.mxu1 %v1104_v31 }
  0x65   : > { %1114 = vmatpush.bf16.msra.mxu3 %v1104_v31 }
  0x68   : > { %820 = vmatpush.bf16.msra.mxu1 %v1103_v32 }
  0x69   : > { %1115 = vmatpush.bf16.msra.mxu3 %v1103_v32 }
  0x6b   : > { %v409_v40 = vpop.permute.xlu2 %408 }
  0x6c   : > { %449 = vst.msk [vmem:[#allocation2 + $0x20] sm:$0xf] %vm440_vm1, %v409_v40 }
  0x73   : > { %v411_v43 = vpop.permute.xlu2 %410 }
  0x74   : > { %450 = vst.msk [vmem:[#allocation2 + $0x24] sm:$0xf] %vm440_vm1, %v411_v43 }
  0x7b   : > { %v397_v45 = vpop.permute.xlu2 %396 }
  0x7c   : > { %443 = vst.msk [vmem:[#allocation2 + $0x8] sm:$0xf] %vm440_vm1, %v397_v45 }
  0x81   : > { %v490_v46 = vpop.permute.xlu1 %489 }
  0x82   : > { %v393_v47 = vpop.permute.xlu0 %392 }
  0x83   : > { %441 = vst.msk [vmem:[#allocation2] sm:$0xf] %vm440_vm1, %v393_v47  ;;  %v496_v50 = vpop.permute.xlu2 %495 }
  0x84   : > { %538 = vst.msk [vmem:[#allocation2] sm:$0xf] %vm537_vm2, %v490_v46 }
  0x89   : > { %v492_v51 = vpop.permute.xlu1 %491 }
  0x8a   : > { %v395_v52 = vpop.permute.xlu0 %394 }
  0x8b   : > { %442 = vst.msk [vmem:[#allocation2 + $0x4] sm:$0xf] %vm440_vm1, %v395_v52  ;;  %v510_v55 = vpop.permute.xlu2 %509 }
  0x8c   : > { %539 = vst.msk [vmem:[#allocation2 + $0x4] sm:$0xf] %vm537_vm2, %v492_v51 }
  0x91   : > { %v508_v56 = vpop.permute.xlu1 %507 }
  0x92   : > { %v506_v57 = vpop.permute.xlu0 %505  ;;  %547 = vst.msk [vmem:[#allocation2 + $0x24] sm:$0xf] %vm537_vm2, %v508_v56 }
  0x93   : > { %v1090_v58 = vld [vmem:[#allocation2] sm:$0xff]  ;;  %546 = vst.msk [vmem:[#allocation2 + $0x20] sm:$0xf] %vm537_vm2, %v506_v57  ;;  %v403_v60 = vpop.permute.xlu2 %402 }
  0x94   : > { %1056 = vmatmul.msk.bf16.vlgmr.msra.gmra.mxu0 %vm654_vm3, %v1090_v58  ;;  %446 = vst.msk [vmem:[#allocation2 + $0x14] sm:$0xf] %vm440_vm1, %v403_v60 }
  0x99   : > { %v494_v61 = vpop.permute.xlu1 %493 }
  0x9a   : > { %v399_v62 = vpop.permute.xlu0 %398  ;;  %540 = vst.msk [vmem:[#allocation2 + $0x8] sm:$0xf] %vm537_vm2, %v494_v61  ;;  %v1094_v63 = vld [vmem:[#allocation2 + $0x20] sm:$0xff] }
  0x9b   : > { %444 = vst.msk [vmem:[#allocation2 + $0xc] sm:$0xf] %vm440_vm1, %v399_v62  ;;  %1060 = vmatmul.msk.bf16.vlgmr.msra.gmra.mxu2 %vm654_vm3, %v1094_v63  ;;  %v417_v1 = vpop.permute.xlu2 %416 }
  0x9c   : > { %541 = vst.msk [vmem:[#allocation2 + $0xc] sm:$0xf] %vm537_vm2, %v496_v50 }
  0x9d   : > { %453 = vst.msk [vmem:[#allocation2 + $0x30] sm:$0xf] %vm440_vm1, %v417_v1 }
  0xa1   : > { %v415_v2 = vpop.permute.xlu1 %414 }
  0xa2   : > { %v413_v3 = vpop.permute.xlu0 %412  ;;  %452 = vst.msk [vmem:[#allocation2 + $0x2c] sm:$0xf] %vm440_vm1, %v415_v2 }
  0xa3   : > { %451 = vst.msk [vmem:[#allocation2 + $0x28] sm:$0xf] %vm440_vm1, %v413_v3  ;;  %v1091_v5 = vld [vmem:[#allocation2 + $0x8] sm:$0xff]  ;;  %v516_v7 = vpop.permute.xlu2 %515 }
  0xa4   : > { %548 = vst.msk [vmem:[#allocation2 + $0x28] sm:$0xf] %vm537_vm2, %v510_v55  ;;  %1057 = vmatmul.msk.bf16.gmra.mxu0 %vm654_vm3, %v1091_v5 }
  0xa9   : > { %v401_v8 = vpop.permute.xlu1 %400 }
  0xaa   : > { %v512_v9 = vpop.permute.xlu0 %511  ;;  %445 = vst.msk [vmem:[#allocation2 + $0x10] sm:$0xf] %vm440_vm1, %v401_v8 }
  0xab   : > { %549 = vst.msk [vmem:[#allocation2 + $0x2c] sm:$0xf] %vm537_vm2, %v512_v9  ;;  %v502_v12 = vpop.permute.xlu2 %501 }
  0xb1   : > { %v500_v13 = vpop.permute.xlu1 %499 }
  0xb2   : > { %v498_v14 = vpop.permute.xlu0 %497  ;;  %543 = vst.msk [vmem:[#allocation2 + $0x14] sm:$0xf] %vm537_vm2, %v500_v13  ;;  %v1095_v15 = vld [vmem:[#allocation2 + $0x28] sm:$0xff] }
  0xb3   : > { %542 = vst.msk [vmem:[#allocation2 + $0x10] sm:$0xf] %vm537_vm2, %v498_v14  ;;  %1061 = vmatmul.msk.bf16.gmra.mxu2 %vm654_vm3, %v1095_v15  ;;  %v423_v16 = vpop.permute.xlu2 %422 }
  0xb4   : > { %456 = vst.msk [vmem:[#allocation2 + $0x3c] sm:$0xf] %vm440_vm1, %v423_v16 }
  0xb9   : > { %v514_v17 = vpop.permute.xlu1 %513 }
  0xba   : > { %v419_v18 = vpop.permute.xlu0 %418  ;;  %550 = vst.msk [vmem:[#allocation2 + $0x30] sm:$0xf] %vm537_vm2, %v514_v17  ;;  %v1092_v19 = vld [vmem:[#allocation2 + $0x10] sm:$0xff] }
  0xbb   : > { %454 = vst.msk [vmem:[#allocation2 + $0x34] sm:$0xf] %vm440_vm1, %v419_v18  ;;  %1058 = vmatmul.msk.bf16.gmra.mxu0 %vm654_vm3, %v1092_v19 }
  0xbc   : > { %551 = vst.msk [vmem:[#allocation2 + $0x34] sm:$0xf] %vm537_vm2, %v516_v7 }
  0xc1   : > { %v407_v20 = vpop.permute.xlu1 %406 }
  0xc2   : > { %v405_v21 = vpop.permute.xlu0 %404  ;;  %448 = vst.msk [vmem:[#allocation2 + $0x1c] sm:$0xf] %vm440_vm1, %v407_v20 }
  0xc3   : > { %447 = vst.msk [vmem:[#allocation2 + $0x18] sm:$0xf] %vm440_vm1, %v405_v21  ;;  %v1096_v22 = vld [vmem:[#allocation2 + $0x30] sm:$0xff] }
  0xc4   : > { %544 = vst.msk [vmem:[#allocation2 + $0x18] sm:$0xf] %vm537_vm2, %v502_v12  ;;  %1062 = vmatmul.msk.bf16.gmra.mxu2 %vm654_vm3, %v1096_v22 }
  0xc9   : > { %v421_v23 = vpop.permute.xlu1 %420 }
  0xca   : > { %v504_v24 = vpop.permute.xlu0 %503  ;;  %455 = vst.msk [vmem:[#allocation2 + $0x38] sm:$0xf] %vm440_vm1, %v421_v23 }
  0xcb   : > { %545 = vst.msk [vmem:[#allocation2 + $0x1c] sm:$0xf] %vm537_vm2, %v504_v24 }
  0xd1   : > { %v520_v25 = vpop.permute.xlu1 %519 }
  0xd2   : > { %v518_v26 = vpop.permute.xlu0 %517  ;;  %553 = vst.msk [vmem:[#allocation2 + $0x3c] sm:$0xf] %vm537_vm2, %v520_v25  ;;  %v1093_v27 = vld [vmem:[#allocation2 + $0x18] sm:$0xff] }
  0xd3   : > { %552 = vst.msk [vmem:[#allocation2 + $0x38] sm:$0xf] %vm537_vm2, %v518_v26  ;;  %1059 = vmatmul.msk.bf16.gmra.mxu0 %vm654_vm3, %v1093_v27  ;;  %v1383_v26 = vld [vmem:[%s1448_s6] ss:$0 sm:$0xff] }
  0xda   : > { %v1097_v28 = vld [vmem:[#allocation2 + $0x38] sm:$0xff] }
  0xdb   : > { %1063 = vmatmul.msk.bf16.gmra.mxu2 %vm654_vm3, %v1097_v28 }
 0x111   : > { %v688_v33 = vpop.f32.mrf.mxu0 }
 0x112   : > { %v689_v35 = vadd.f32 %v1126_v34, %v688_v33 }
 0x114   : > { %v728_v38 = vmax.f32 %v689_v35, 0.0 }
 0x119   : > { %v690_v36 = vpop.f32.mrf.mxu0 }
 0x11a   : > { %v691_v37 = vadd.f32 %v1126_v34, %v690_v36 }
 0x11c   : > { %v729_v39 = vmax.f32 %v691_v37, 0.0 }
 0x11e   : > { %v744_v40 = vpack.c.bf16 %v729_v39, %v728_v38  ;;  %v708_v42 = vpop.f32.mrf.mxu2 }
 0x11f   : > { %v709_v18 = vadd.f32 %v1126_v34, %v708_v42 }
 0x120   : > { %1080 = vmatmul.msk.bf16.vlgmr.msra.gmra.mxu1 %vm788_vm4, %v744_v40 }
 0x121   : > { %v693_v41 = vpop.f32.mrf.mxu0  ;;  %v736_v23 = vmax.f32 %v709_v18, 0.0 }
 0x122   : > { %v694_v43 = vadd.f32 %v1126_v34, %v693_v41 }
 0x124   : > { %v730_v46 = vmax.f32 %v694_v43, 0.0 }
 0x126   : > { %v710_v48 = vpop.f32.mrf.mxu2 }
 0x127   : > { %v711_v15 = vadd.f32 %v1126_v34, %v710_v48 }
 0x129   : > { %v695_v44 = vpop.f32.mrf.mxu0  ;;  %v737_v20 = vmax.f32 %v711_v15, 0.0 }
 0x12a   : > { %v696_v45 = vadd.f32 %v1126_v34, %v695_v44 }
 0x12b   : > { %v748_v25 = vpack.c.bf16 %v737_v20, %v736_v23 }
 0x12c   : > { %v731_v47 = vmax.f32 %v696_v45, 0.0 }
 0x12e   : > { %v745_v49 = vpack.c.bf16 %v731_v47, %v730_v46 }
 0x130   : > { %1081 = vmatmul.msk.bf16.gmra.mxu1 %vm788_vm4, %v745_v49 }
 0x136   : > { %v713_v50 = vpop.f32.mrf.mxu2 }
 0x137   : > { %v714_v52 = vadd.f32 %v1126_v34, %v713_v50 }
 0x138   : > { %v698_v51 = vpop.f32.mrf.mxu0 }
 0x139   : > { %v699_v54 = vadd.f32 %v1126_v34, %v698_v51  ;;  %v738_v57 = vmax.f32 %v714_v52, 0.0 }
 0x13b   : > { %v732_v60 = vmax.f32 %v699_v54, 0.0 }
 0x13e   : > { %v715_v53 = vpop.f32.mrf.mxu2 }
 0x13f   : > { %v716_v55 = vadd.f32 %v1126_v34, %v715_v53 }
 0x140   : > { %v700_v56 = vpop.f32.mrf.mxu0 }
 0x141   : > { %v739_v58 = vmax.f32 %v716_v55, 0.0  ;;  %v701_v59 = vadd.f32 %v1126_v34, %v700_v56 }
 0x143   : > { %v749_v61 = vpack.c.bf16 %v739_v58, %v738_v57  ;;  %v733_v62 = vmax.f32 %v701_v59, 0.0 }
 0x145   : > { %v746_v63 = vpack.c.bf16 %v733_v62, %v732_v60  ;;  %1085 = vmatmul.msk.bf16.vlgmr.msra.gmra.mxu3 %vm788_vm4, %v749_v61 }
 0x147   : > { %v718_v0 = vpop.f32.mrf.mxu2  ;;  %1082 = vmatmul.msk.bf16.gmra.mxu1 %vm788_vm4, %v746_v63 }
 0x148   : > { %v719_v1 = vadd.f32 %v1126_v34, %v718_v0 }
 0x14a   : > { %v740_v5 = vmax.f32 %v719_v1, 0.0 }
 0x14f   : > { %v720_v2 = vpop.f32.mrf.mxu2 }
 0x150   : > { %v721_v3 = vadd.f32 %v1126_v34, %v720_v2  ;;  %v703_v4 = vpop.f32.mrf.mxu0 }
 0x151   : > { %v704_v8 = vadd.f32 %v1126_v34, %v703_v4 }
 0x152   : > { %v741_v6 = vmax.f32 %v721_v3, 0.0 }
 0x153   : > { %v734_v11 = vmax.f32 %v704_v8, 0.0 }
 0x154   : > { %v750_v7 = vpack.c.bf16 %v741_v6, %v740_v5 }
 0x156   : > { %1086 = vmatmul.msk.bf16.gmra.mxu3 %vm788_vm4, %v750_v7 }
 0x158   : > { %v705_v9 = vpop.f32.mrf.mxu0 }
 0x159   : > { %v706_v10 = vadd.f32 %v1126_v34, %v705_v9 }
 0x15b   : > { %v735_v12 = vmax.f32 %v706_v10, 0.0 }
 0x15d   : > { %v747_v13 = vpack.c.bf16 %v735_v12, %v734_v11 }
 0x15e   : > { %v723_v14 = vpop.f32.mrf.mxu2 }
 0x15f   : > { %1083 = vmatmul.msk.bf16.gmra.mxu1 %vm788_vm4, %v747_v13  ;;  %v724_v16 = vadd.f32 %v1126_v34, %v723_v14 }
 0x161   : > { %v742_v21 = vmax.f32 %v724_v16, 0.0 }
 0x166   : > { %v725_v17 = vpop.f32.mrf.mxu2 }
 0x167   : > { %v726_v19 = vadd.f32 %v1126_v34, %v725_v17 }
 0x169   : > { %v743_v22 = vmax.f32 %v726_v19, 0.0 }
 0x16b   : > { %v751_v24 = vpack.c.bf16 %v743_v22, %v742_v21 }
 0x16d   : > { %1087 = vmatmul.msk.bf16.gmra.mxu3 %vm788_vm4, %v751_v24 }
 0x16f   : > { %1084 = vmatmul.msk.bf16.gmra.mxu1 %vm788_vm4, %v748_v25 }
 0x19d   : > { %v822_v27 = vpop.f32.mrf.mxu1 }
 0x19e   : > { %v823_v28 = vadd.f32 %v1383_v26, %v822_v27 }
 0x1a0   : > { %v862_v29 = vmax.f32 %v823_v28, 0.0 }
 0x1a2   : > { %v878_v30 = vpack.c.bf16 %v862_v29, %v862_v29 }
 0x1a4   : > { %895 = vst.msk [vmem:[%s1390_s19] sm:$0xf] %vm894_vm5, %v878_v30 }
 0x1a5   : > { %v824_v31 = vpop.f32.mrf.mxu1 }
 0x1a6   : > { %v825_v32 = vadd.f32 %v1383_v26, %v824_v31 }
 0x1a8   : > { %v863_v33 = vmax.f32 %v825_v32, 0.0 }
 0x1aa   : > { %v879_v34 = vpack.c.bf16 %v863_v33, %v863_v33 }
 0x1ac   : > { %896 = vst.msk [vmem:[%s1390_s19 + $0x4] sm:$0xf] %vm894_vm5, %v879_v34 }
 0x1ad   : > { %v827_v35 = vpop.f32.mrf.mxu1 }
 0x1ae   : > { %v828_v36 = vadd.f32 %v1383_v26, %v827_v35 }
 0x1b0   : > { %v864_v37 = vmax.f32 %v828_v36, 0.0 }
 0x1b2   : > { %v880_v38 = vpack.c.bf16 %v864_v37, %v864_v37 }
 0x1b4   : > { %897 = vst.msk [vmem:[%s1390_s19 + $0x8] sm:$0xf] %vm894_vm5, %v880_v38 }
 0x1b5   : > { %v829_v39 = vpop.f32.mrf.mxu1 }
 0x1b6   : > { %v830_v40 = vadd.f32 %v1383_v26, %v829_v39 }
 0x1b8   : > { %v865_v41 = vmax.f32 %v830_v40, 0.0 }
 0x1ba   : > { %v881_v42 = vpack.c.bf16 %v865_v41, %v865_v41 }
 0x1bc   : > { %898 = vst.msk [vmem:[%s1390_s19 + $0xc] sm:$0xf] %vm894_vm5, %v881_v42 }
 0x1c4   : > { %v832_v43 = vpop.f32.mrf.mxu1 }
 0x1c5   : > { %v833_v44 = vadd.f32 %v1383_v26, %v832_v43 }
 0x1c7   : > { %v866_v45 = vmax.f32 %v833_v44, 0.0 }
 0x1c8   : > { %v847_v46 = vpop.f32.mrf.mxu3 }
 0x1c9   : > { %v882_v47 = vpack.c.bf16 %v866_v45, %v866_v45  ;;  %v848_v48 = vadd.f32 %v1383_v26, %v847_v46 }
 0x1cb   : > { %899 = vst.msk [vmem:[%s1390_s19 + $0x10] sm:$0xf] %vm894_vm5, %v882_v47  ;;  %v872_v49 = vmax.f32 %v848_v48, 0.0 }
 0x1cc   : > { %v834_v50 = vpop.f32.mrf.mxu1 }
 0x1cd   : > { %v888_v51 = vpack.c.bf16 %v872_v49, %v872_v49  ;;  %v835_v52 = vadd.f32 %v1383_v26, %v834_v50 }
 0x1cf   : > { %905 = vst.msk [vmem:[%s1390_s19 + $0x28] sm:$0xf] %vm894_vm5, %v888_v51  ;;  %v867_v53 = vmax.f32 %v835_v52, 0.0 }
 0x1d0   : > { %v849_v54 = vpop.f32.mrf.mxu3 }
 0x1d1   : > { %v883_v55 = vpack.c.bf16 %v867_v53, %v867_v53  ;;  %v850_v56 = vadd.f32 %v1383_v26, %v849_v54 }
 0x1d3   : > { %900 = vst.msk [vmem:[%s1390_s19 + $0x14] sm:$0xf] %vm894_vm5, %v883_v55  ;;  %v873_v57 = vmax.f32 %v850_v56, 0.0 }
 0x1d5   : > { %v889_v58 = vpack.c.bf16 %v873_v57, %v873_v57 }
 0x1d7   : > { %906 = vst.msk [vmem:[%s1390_s19 + $0x2c] sm:$0xf] %vm894_vm5, %v889_v58 }
 0x1d9   : > { %v852_v59 = vpop.f32.mrf.mxu3 }
 0x1da   : > { %v853_v60 = vadd.f32 %v1383_v26, %v852_v59 }
 0x1dc   : > { %v874_v61 = vmax.f32 %v853_v60, 0.0  ;;  %v837_v62 = vpop.f32.mrf.mxu1 }
 0x1dd   : > { %v838_v63 = vadd.f32 %v1383_v26, %v837_v62 }
 0x1de   : > { %v890_v0 = vpack.c.bf16 %v874_v61, %v874_v61 }
 0x1df   : > { %v868_v1 = vmax.f32 %v838_v63, 0.0 }
 0x1e0   : > { %907 = vst.msk [vmem:[%s1390_s19 + $0x30] sm:$0xf] %vm894_vm5, %v890_v0 }
 0x1e1   : > { %v884_v2 = vpack.c.bf16 %v868_v1, %v868_v1  ;;  %v854_v3 = vpop.f32.mrf.mxu3 }
 0x1e2   : > { %v855_v4 = vadd.f32 %v1383_v26, %v854_v3 }
 0x1e3   : > { %901 = vst.msk [vmem:[%s1390_s19 + $0x18] sm:$0xf] %vm894_vm5, %v884_v2 }
 0x1e4   : > { %v875_v5 = vmax.f32 %v855_v4, 0.0  ;;  %v839_v6 = vpop.f32.mrf.mxu1 }
 0x1e5   : > { %v840_v7 = vadd.f32 %v1383_v26, %v839_v6 }
 0x1e6   : > { %v891_v8 = vpack.c.bf16 %v875_v5, %v875_v5 }
 0x1e7   : > { %v869_v9 = vmax.f32 %v840_v7, 0.0 }
 0x1e8   : > { %908 = vst.msk [vmem:[%s1390_s19 + $0x34] sm:$0xf] %vm894_vm5, %v891_v8 }
 0x1e9   : > { %v885_v10 = vpack.c.bf16 %v869_v9, %v869_v9 }
 0x1eb   : > { %902 = vst.msk [vmem:[%s1390_s19 + $0x1c] sm:$0xf] %vm894_vm5, %v885_v10 }
 0x1ec   : > { %v842_v11 = vpop.f32.mrf.mxu1 }
 0x1ed   : > { %v843_v12 = vadd.f32 %v1383_v26, %v842_v11 }
 0x1ef   : > { %v870_v13 = vmax.f32 %v843_v12, 0.0 }
 0x1f0   : > { %v857_v14 = vpop.f32.mrf.mxu3 }
 0x1f1   : > { %v886_v15 = vpack.c.bf16 %v870_v13, %v870_v13  ;;  %v858_v16 = vadd.f32 %v1383_v26, %v857_v14 }
 0x1f3   : > { %903 = vst.msk [vmem:[%s1390_s19 + $0x20] sm:$0xf] %vm894_vm5, %v886_v15  ;;  %v876_v17 = vmax.f32 %v858_v16, 0.0 }
 0x1f4   : > { %v844_v18 = vpop.f32.mrf.mxu1 }
 0x1f5   : > { %v892_v19 = vpack.c.bf16 %v876_v17, %v876_v17  ;;  %v845_v20 = vadd.f32 %v1383_v26, %v844_v18 }
 0x1f7   : > { %909 = vst.msk [vmem:[%s1390_s19 + $0x38] sm:$0xf] %vm894_vm5, %v892_v19  ;;  %v871_v21 = vmax.f32 %v845_v20, 0.0 }
 0x1f8   : > { %v859_v22 = vpop.f32.mrf.mxu3 }
 0x1f9   : > { %v887_v23 = vpack.c.bf16 %v871_v21, %v871_v21  ;;  %v860_v24 = vadd.f32 %v1383_v26, %v859_v22 }
 0x1fb   : > { %904 = vst.msk [vmem:[%s1390_s19 + $0x24] sm:$0xf] %vm894_vm5, %v887_v23  ;;  %v877_v25 = vmax.f32 %v860_v24, 0.0 }
 0x1fd   : > { %v893_v27 = vpack.c.bf16 %v877_v25, %v877_v25 }
 0x1ff   : > { %910 = vst.msk [vmem:[%s1390_s19 + $0x3c] sm:$0xf] %vm894_vm5, %v893_v27 }
 0x200 PF: > { %s17_s24 = sadd.s32 1, %s1134_s24  }
 0x201   : > { %p14_p4 = scmp.ge.s32.totalorder %s17_s24, 4  }
 0x203   :  { %16 = sbr.rel (!%p14_p4) target bundleno = 1 (0x1), region = 84 }

</bundles_post_ra>
